<compile_context>
chip_gen: v7x
topology: tpu7x:2x2x1
jax: 0.10.0
libtpu: 0.0.40
codegen_flags: <defaults>
</compile_context>

<pallas_src>
import functools

import jax
import jax.numpy as jnp
from jax.experimental import pallas as pl
from jax.experimental.pallas import tpu as pltpu


def _cdiv(a, b):
    return -(-a // b)


def _round_up(x, m):
    return ((x + m - 1) // m) * m


def _vmem_budget_bytes():
    """~75% of this generation's physical VMEM (64 MiB v7x, 128 MiB v5e/v6e)."""
    try:
        cap = int(pltpu.get_tpu_info().vmem_capacity_bytes)
    except Exception:
        cap = 64 << 20  # conservative (safe on every generation)
    return max(int(cap * 0.75), 16 << 20)


def _linear_kernel(x_ref, w_ref, b_ref, o_ref, *, compute_dtype):
    # x_ref: (TM, K)  batch tile        w_ref: (K, TN)  weight tile (pre-transposed)
    # b_ref: (1, TN)  bias tile (f32)   o_ref: (TM, TN)
    x = x_ref[...]
    if compute_dtype is not None and x.dtype != compute_dtype:
        x = x.astype(compute_dtype)  # in-kernel cast: no extra HBM pass over x
    acc = jnp.dot(x, w_ref[...], preferred_element_type=jnp.float32)
    o_ref[...] = (acc + b_ref[...]).astype(o_ref.dtype)


def linear_forward(x, w, b, *, compute_dtype=None, tn=None, force_w_tiling=False):
    """y = x @ w.T + b  (exact nn.Linear semantics).

    x: (N, input_dim), w: (output_dim, input_dim), b: (output_dim,)
    """
    n, in_dim = x.shape
    out_dim, in_dim_w = w.shape
    assert in_dim == in_dim_w and b.shape == (out_dim,)
    out_dtype = x.dtype

    # One-time (tiny) wrapper work: transpose W; cast only W/bias for bf16 path.
    w_t = w.T
    if compute_dtype is not None:
        w_t = w_t.astype(compute_dtype)
    b2 = b.astype(jnp.float32).reshape(1, out_dim)

    xb = jnp.dtype(x.dtype).itemsize
    wb = jnp.dtype(w_t.dtype).itemsize
    ob = jnp.dtype(out_dtype).itemsize

    vmem_budget = _vmem_budget_bytes()
    kernel = functools.partial(_linear_kernel, compute_dtype=compute_dtype)

    cost = pl.CostEstimate(
        flops=2 * n * in_dim * out_dim,
        transcendentals=0,
        bytes_accessed=(n * in_dim * xb + in_dim * out_dim * wb
                        + out_dim * 4 + n * out_dim * ob),
    )

    def choose_tm(per_row_bytes, reserved_bytes):
        # Fill ~55% of the VMEM budget with double-buffered x/y tiles, but keep
        # >= ~4 grid steps over the batch (2 per v7x TensorCore) when N is big.
        target = int(0.55 * vmem_budget)
        avail = max(target - reserved_bytes, 8 * per_row_bytes)
        tm = min(avail // per_row_bytes,
                 _round_up(_cdiv(n, 4), 256),
                 4096,
                 _round_up(n, 8))
        return max(8, (int(tm) // 8) * 8)

    w_bytes = in_dim * out_dim * wb + out_dim * 4
    tile_w = force_w_tiling or (w_bytes > vmem_budget // 3)

    if not tile_w:
        # ---- Path A: W + bias VMEM-resident, batch-tiled x/y, 1-D parallel grid ----
        per_row = 2 * (in_dim * xb + out_dim * ob)   # double-buffered x + y rows
        tm = choose_tm(per_row, w_bytes)
        grid = (_cdiv(n, tm),)

        def run(single_buffer_resident):
            res = (dict(pipeline_mode=pl.Buffered(1))
                   if single_buffer_resident else {})
            return pl.pallas_call(
                kernel,
                out_shape=jax.ShapeDtypeStruct((n, out_dim), out_dtype),
                grid_spec=pltpu.PrefetchScalarGridSpec(
                    num_scalar_prefetch=0,
                    grid=grid,
                    in_specs=[
                        pl.BlockSpec((tm, in_dim), lambda i: (i, 0)),        # x tile
                        pl.BlockSpec((in_dim, out_dim), lambda i: (0, 0), **res),  # W
                        pl.BlockSpec((1, out_dim), lambda i: (0, 0), **res),       # b
                    ],
                    out_specs=pl.BlockSpec((tm, out_dim), lambda i: (i, 0)),
                ),
                compiler_params=pltpu.CompilerParams(
                    dimension_semantics=("parallel",),
                    vmem_limit_bytes=vmem_budget,
                ),
                cost_estimate=cost,
            )(x, w_t, b2)

        try:
            return run(True)    # single-buffer the grid-invariant W / bias
        except Exception:
            return run(False)   # fall back if pipeline_mode/Buffered(1) unsupported

    # ---- Path B: W too large for residency -> 2-D grid tiling out_dim as well ----
    if tn is None:
        # Double-buffered W tile should use at most ~1/4 of the budget.
        tn = max(128, ((vmem_budget // 4) // (2 * in_dim * wb)) // 128 * 128)
    tn = min(tn, _round_up(out_dim, 128))
    per_row = 2 * (in_dim * xb + tn * ob)
    tm = choose_tm(per_row, 2 * (in_dim * tn * wb + tn * 4))
    grid = (_cdiv(n, tm), _cdiv(out_dim, tn))

    return pl.pallas_call(
        kernel,
        out_shape=jax.ShapeDtypeStruct((n, out_dim), out_dtype),
        grid_spec=pltpu.PrefetchScalarGridSpec(
            num_scalar_prefetch=0,
            grid=grid,
            in_specs=[
                pl.BlockSpec((tm, in_dim), lambda i, j: (i, 0)),   # x tile (reused over j)
                pl.BlockSpec((in_dim, tn), lambda i, j: (0, j)),   # W column tile
                pl.BlockSpec((1, tn), lambda i, j: (0, j)),        # bias tile
            ],
            out_specs=pl.BlockSpec((tm, tn), lambda i, j: (i, j)),
        ),
        compiler_params=pltpu.CompilerParams(
            dimension_semantics=("parallel", "parallel"),
            vmem_limit_bytes=vmem_budget,
        ),
        cost_estimate=cost,
    )(x, w_t, b2)


if __name__ == "__main__":
    key = jax.random.PRNGKey(0)
    k1, k2, k3, k4, k5, k6, k7, k8, k9 = jax.random.split(key, 9)

    # --- Case 1: small shapes implied by LinearRegression(input_dim, output_dim) ---
    batch, in_dim, out_dim = 8, 32, 16
    bound = 1.0 / (in_dim ** 0.5)
    w = jax.random.uniform(k1, (out_dim, in_dim), jnp.float32, -bound, bound)
    b = jax.random.uniform(k2, (out_dim,), jnp.float32, -bound, bound)
    x = jax.random.normal(k3, (batch, in_dim), jnp.float32)
    y = jax.block_until_ready(linear_forward(x, w, b))
    assert y.shape == (batch, out_dim)
    assert jnp.allclose(y, x @ w.T + b, atol=1e-5, rtol=1e-5)

    # --- Case 2: larger batch -> resident-W path with a real (>=4-step) grid ---
    batch, in_dim, out_dim = 1024, 256, 128
    bound = 1.0 / (in_dim ** 0.5)
    w = jax.random.uniform(k4, (out_dim, in_dim), jnp.float32, -bound, bound)
    b = jax.random.uniform(k5, (out_dim,), jnp.float32, -bound, bound)
    x = jax.random.normal(k6, (batch, in_dim), jnp.float32)
    y = jax.block_until_ready(linear_forward(x, w, b))
    assert y.shape == (batch, out_dim)
    assert jnp.allclose(y, x @ w.T + b, atol=1e-4, rtol=1e-4)

    # --- Case 3: exercise the tiled-W fallback path (2-D grid over batch x out) ---
    batch, in_dim, out_dim = 512, 128, 256
    bound = 1.0 / (in_dim ** 0.5)
    w = jax.random.uniform(k7, (out_dim, in_dim), jnp.float32, -bound, bound)
    b = jax.random.uniform(k8, (out_dim,), jnp.float32, -bound, bound)
    x = jax.random.normal(k9, (batch, in_dim), jnp.float32)
    y = jax.block_until_ready(linear_forward(x, w, b, force_w_tiling=True, tn=128))
    assert y.shape == (batch, out_dim)
    assert jnp.allclose(y, x @ w.T + b, atol=1e-4, rtol=1e-4)

    print("KERNEL_OK")
</pallas_src>

<mosaic_0001>
module attributes {stable_mosaic.version = 11 : i64} {
  func.func @_linear_kernel(%arg0: i32, %arg1: memref<8x32xf32, #tpu.memory_space<vmem>>, %arg2: memref<32x16xf32, #tpu.memory_space<vmem>>, %arg3: memref<1x16xf32, #tpu.memory_space<vmem>>, %arg4: memref<8x16xf32, #tpu.memory_space<vmem>>) attributes {dimension_semantics = [#tpu.dimension_semantics<parallel>], iteration_bounds = array<i64: 1>, scalar_prefetch = 0 : i64, scratch_operands = 0 : i64, tpu.core_type = #tpu.core_type<tc>, window_params = [{transform_indices = @transform_0, window_bounds = array<i64: 8, 32>}, {pipeline_mode = #tpu.pipeline_mode<synchronous>, transform_indices = @transform_1, window_bounds = array<i64: 32, 16>}, {pipeline_mode = #tpu.pipeline_mode<synchronous>, transform_indices = @transform_2, window_bounds = array<i64: 1, 16>}, {transform_indices = @transform_3, window_bounds = array<i64: 8, 16>}]} {
    %c0 = arith.constant 0 : index
    %c0_0 = arith.constant 0 : index
    %0 = vector.load %arg1[%c0, %c0_0] : memref<8x32xf32, #tpu.memory_space<vmem>>, vector<8x32xf32>
    %c0_1 = arith.constant 0 : index
    %c0_2 = arith.constant 0 : index
    %1 = vector.load %arg2[%c0_1, %c0_2] : memref<32x16xf32, #tpu.memory_space<vmem>>, vector<32x16xf32>
    %cst = arith.constant dense<0.000000e+00> : vector<8x16xf32>
    %2 = tpu.matmul %0, %1, %cst {dimension_numbers = #tpu.dot_dimension_numbers<[1], [0], [0], [1], [0, 0, 1, 1], [], []>} : vector<8x32xf32>, vector<32x16xf32>, vector<8x16xf32> -> vector<8x16xf32>
    %c0_3 = arith.constant 0 : index
    %c0_4 = arith.constant 0 : index
    %3 = vector.load %arg3[%c0_3, %c0_4] : memref<1x16xf32, #tpu.memory_space<vmem>>, vector<1x16xf32>
    %4 = vector.broadcast %3 : vector<1x16xf32> to vector<8x16xf32>
    %5 = arith.addf %2, %4 : vector<8x16xf32>
    %c0_5 = arith.constant 0 : index
    %c0_6 = arith.constant 0 : index
    %6 = vector.load %arg4[%c0_5, %c0_6] : memref<8x16xf32, #tpu.memory_space<vmem>>, vector<8x16xf32>
    tpu.vector_store %arg4[%c0_5, %c0_6], %5 {strides = array<i32>} : memref<8x16xf32, #tpu.memory_space<vmem>>, vector<8x16xf32>,
    return
  }
  func.func @transform_0(%arg0: i32) -> (i32, i32) {
    %c0_i32 = arith.constant 0 : i32
    %c0_i32_0 = arith.constant 0 : i32
    return %arg0, %c0_i32 : i32, i32
  }
  func.func @transform_1(%arg0: i32) -> (i32, i32) {
    %c0_i32 = arith.constant 0 : i32
    %c0_i32_0 = arith.constant 0 : i32
    %c0_i32_1 = arith.constant 0 : i32
    return %c0_i32, %c0_i32_0 : i32, i32
  }
  func.func @transform_2(%arg0: i32) -> (i32, i32) {
    %c0_i32 = arith.constant 0 : i32
    %c0_i32_0 = arith.constant 0 : i32
    %c0_i32_1 = arith.constant 0 : i32
    return %c0_i32, %c0_i32_0 : i32, i32
  }
  func.func @transform_3(%arg0: i32) -> (i32, i32) {
    %c0_i32 = arith.constant 0 : i32
    %c0_i32_0 = arith.constant 0 : i32
    return %arg0, %c0_i32 : i32, i32
  }
}

module attributes {stable_mosaic.version = 11 : i64} {
  func.func @_linear_kernel(%arg0: i32, %arg1: memref<8x32xf32, #tpu.memory_space<vmem>>, %arg2: memref<32x16xf32, #tpu.memory_space<vmem>>, %arg3: memref<1x16xf32, #tpu.memory_space<vmem>>, %arg4: memref<8x16xf32, #tpu.memory_space<vmem>>) attributes {dimension_semantics = [#tpu.dimension_semantics<parallel>], iteration_bounds = array<i64: 1>, scalar_prefetch = 0 : i64, scratch_operands = 0 : i64, tpu.core_type = #tpu.core_type<tc>, window_params = [{transform_indices = @transform_0, window_bounds = array<i64: 8, 32>}, {pipeline_mode = #tpu.pipeline_mode<synchronous>, transform_indices = @transform_1, window_bounds = array<i64: 32, 16>}, {pipeline_mode = #tpu.pipeline_mode<synchronous>, transform_indices = @transform_2, window_bounds = array<i64: 1, 16>}, {transform_indices = @transform_3, window_bounds = array<i64: 8, 16>}]} {
    %c0 = arith.constant 0 : index
    %c0_0 = arith.constant 0 : index
    %0 = vector.load %arg1[%c0, %c0_0] : memref<8x32xf32, #tpu.memory_space<vmem>>, vector<8x32xf32>
    %c0_1 = arith.constant 0 : index
    %c0_2 = arith.constant 0 : index
    %1 = vector.load %arg2[%c0_1, %c0_2] : memref<32x16xf32, #tpu.memory_space<vmem>>, vector<32x16xf32>
    %cst = arith.constant dense<0.000000e+00> : vector<8x16xf32>
    %2 = tpu.matmul %0, %1, %cst {dimension_numbers = #tpu.dot_dimension_numbers<[1], [0], [0], [1], [0, 0, 1, 1], [], []>} : vector<8x32xf32>, vector<32x16xf32>, vector<8x16xf32> -> vector<8x16xf32>
    %c0_3 = arith.constant 0 : index
    %c0_4 = arith.constant 0 : index
    %3 = vector.load %arg3[%c0_3, %c0_4] : memref<1x16xf32, #tpu.memory_space<vmem>>, vector<1x16xf32>
    %4 = vector.broadcast %3 : vector<1x16xf32> to vector<8x16xf32>
    %5 = arith.addf %2, %4 : vector<8x16xf32>
    %c0_5 = arith.constant 0 : index
    %c0_6 = arith.constant 0 : index
    %6 = vector.load %arg4[%c0_5, %c0_6] : memref<8x16xf32, #tpu.memory_space<vmem>>, vector<8x16xf32>
    tpu.vector_store %arg4[%c0_5, %c0_6], %5 {strides = array<i32>} : memref<8x16xf32, #tpu.memory_space<vmem>>, vector<8x16xf32>,
    return
  }
  func.func @transform_0(%arg0: i32) -> (i32, i32) {
    %c0_i32 = arith.constant 0 : i32
    %c0_i32_0 = arith.constant 0 : i32
    return %arg0, %c0_i32 : i32, i32
  }
  func.func @transform_1(%arg0: i32) -> (i32, i32) {
    %c0_i32 = arith.constant 0 : i32
    %c0_i32_0 = arith.constant 0 : i32
    %c0_i32_1 = arith.constant 0 : i32
    return %c0_i32, %c0_i32_0 : i32, i32
  }
  func.func @transform_2(%arg0: i32) -> (i32, i32) {
    %c0_i32 = arith.constant 0 : i32
    %c0_i32_0 = arith.constant 0 : i32
    %c0_i32_1 = arith.constant 0 : i32
    return %c0_i32, %c0_i32_0 : i32, i32
  }
  func.func @transform_3(%arg0: i32) -> (i32, i32) {
    %c0_i32 = arith.constant 0 : i32
    %c0_i32_0 = arith.constant 0 : i32
    return %arg0, %c0_i32 : i32, i32
  }
}

</mosaic_0001>

<bundles_post_ra>
// kernel: tpu_custom_call.1
= control target key start
LH: loop header
LB: loop body
LE: loop exit
PB: predicated region body
PF: predicated region fallthrough
CT: control target
= control target key end

     0   :  { %v169_v3 = vmov 0.0|0.0   ;;  %vm170_vm0 = vmmov 0   ;;  %v171_v6 = vmov 0.0   ;;  %s223_s0 = inlined_call_operand.vmem [shape: f32[8,32], index: 0, kind: input, shape index: {}]   ;;  %s224_s1 = inlined_call_operand.vmem [shape: f32[32,16], index: 1, kind: input, shape index: {}]   ;;  %s225_s2 = inlined_call_operand.vmem [shape: f32[1,16], index: 2, kind: input, shape index: {}]   ;;  %s226_s3 = inlined_call_operand.hbm [shape: f32[8,16], index: 3, kind: output, shape index: {}]  }
   0x1   :  { %v16_v0 = vld [vmem:[%s224_s1] sm:$0xff]  ;;  %v17_v1 = vld [vmem:[%s224_s1 + $0x8] sm:$0xff]  ;;  %v18_v2 = vld [vmem:[%s224_s1 + $0x10] sm:$0xff]  ;;  %135 = vmatprep.subr.bf16.mxu0 %v169_v3  ;;  %132 = vmatprep.mubr.msk.f32.mxu0 %vm170_vm0, %v171_v6 }
   0x2   :  { %v136_v4 = vpack.c.bf16 %v17_v1, %v16_v0  ;;  %v19_v5 = vld [vmem:[%s224_s1 + $0x18] sm:$0xff] }
   0x3   :  { %8 = vsyncpa [#allocation3], 0  ;;  %v139_v7 = vpack.c.bf16 %v19_v5, %v18_v2  ;;  %v15_v8 = vld [vmem:[%s223_s0] sm:$0xff]  ;;  %vm27_vm1 = vcmask 261120   ;;  %s172_s24 = smov [#allocation2]   ;;  %vm101_vm2 = vcmask 130048  }
   0x4   :  { %137 = vmatpush3.bf16.msra.mxu0 %v136_v4  ;;  %v117_v9 = vld [vmem:[%s225_s2] ss:$0 sm:$0xff]  ;;  %s109_s1 = sshll.u32 %s172_s24, 4  ;;  %s110_s1 = int_to_ptr.vmem [resolvable:$true] %s109_s1 }
   0x5   :  { %138 = vmatprep.subr.bf16.mxu0 %v169_v3  ;;  %s145_s25 = scalar_lea.vmem %s110_s1, 128  ;;  %p150_p1 = scmp.lt.s32.totalorder %s110_s1, %s110_s1 }
   0x6   :  { %p146_p0 = scmp.ne.s32.totalorder %s110_s1, %s145_s25  ;;  %p151_p2 = scmp.lt.s32.totalorder %s145_s25, %s145_s25 }
   0x8   :  { %140 = vmatpush3.bf16.msra.mxu0 %v139_v7  ;;  %p152_p3 = por %p151_p2, %p150_p1 }
   0xa   :  { %p153_p4 = pnand %p152_p3, %p146_p0 }
   0xb   :  { %133 = vmatmul.mubr.msk.f32.vlgmr.msra.gmra.mrb[0].mxu0 %vm27_vm1, %v15_v8 }
  0xde   :  { %v97_v10 = vpop.f32.mrb[0].mxu0 }
  0xdf   :  { %v98_v11 = vadd.f32 %v117_v9, %v97_v10  ;;  %v134_v12 = vpop.f32.mrb[1].mxu0 }
  0xe1   :  { %102 = vst.msk [vmem:[#allocation2] sm:$0xff] %vm101_vm2, %v98_v11 }
  0xe2   :  { %156 = shalt.err (!%p153_p4)
}
  0xe3   :  { %s157_s27 = scalar_lea.hbm %s226_s3, 128 }
  0xe4   :  { %p158_p5 = scmp.ne.s32.totalorder %s226_s3, %s157_s27  ;;  %p161_p6 = scmp.lt.u32.totalorder %s157_s27, %s226_s3 }
  0xe6   :  { %p163_p7 = pnand %p161_p6, %p158_p5 }
  0xe8   :  { %166 = shalt.err (!%p163_p7)
}
  0xe9   :  { %112 = dma.vmem_to_hbm [thread:$0]  %s110_s1, 128, %s226_s3, [#allocation3]  }
  0xea   :  { %167 = dma.done.wait [#allocation3], 128  }
  0xeb   :  { %168 = vsyncadd [#allocation3], 4294967168 }
  0xec   :  { %116 = vsyncpa [#allocation3], 1 }

// kernel: tpu_custom_call.1
= control target key start
LH: loop header
LB: loop body
LE: loop exit
PB: predicated region body
PF: predicated region fallthrough
CT: control target
= control target key end

     0   :  { %v169_v3 = vmov 0.0|0.0   ;;  %vm170_vm0 = vmmov 0   ;;  %v171_v6 = vmov 0.0   ;;  %s223_s0 = inlined_call_operand.vmem [shape: f32[8,32], index: 0, kind: input, shape index: {}]   ;;  %s224_s1 = inlined_call_operand.vmem [shape: f32[32,16], index: 1, kind: input, shape index: {}]   ;;  %s225_s2 = inlined_call_operand.vmem [shape: f32[1,16], index: 2, kind: input, shape index: {}]   ;;  %s226_s3 = inlined_call_operand.hbm [shape: f32[8,16], index: 3, kind: output, shape index: {}]  }
   0x1   :  { %v16_v0 = vld [vmem:[%s224_s1] sm:$0xff]  ;;  %v17_v1 = vld [vmem:[%s224_s1 + $0x8] sm:$0xff]  ;;  %v18_v2 = vld [vmem:[%s224_s1 + $0x10] sm:$0xff]  ;;  %135 = vmatprep.subr.bf16.mxu0 %v169_v3  ;;  %132 = vmatprep.mubr.msk.f32.mxu0 %vm170_vm0, %v171_v6 }
   0x2   :  { %v136_v4 = vpack.c.bf16 %v17_v1, %v16_v0  ;;  %v19_v5 = vld [vmem:[%s224_s1 + $0x18] sm:$0xff] }
   0x3   :  { %8 = vsyncpa [#allocation3], 0  ;;  %v139_v7 = vpack.c.bf16 %v19_v5, %v18_v2  ;;  %v15_v8 = vld [vmem:[%s223_s0] sm:$0xff]  ;;  %vm27_vm1 = vcmask 261120   ;;  %s172_s24 = smov [#allocation2]   ;;  %vm101_vm2 = vcmask 130048  }
   0x4   :  { %137 = vmatpush3.bf16.msra.mxu0 %v136_v4  ;;  %v117_v9 = vld [vmem:[%s225_s2] ss:$0 sm:$0xff]  ;;  %s109_s1 = sshll.u32 %s172_s24, 4  ;;  %s110_s1 = int_to_ptr.vmem [resolvable:$true] %s109_s1 }
   0x5   :  { %138 = vmatprep.subr.bf16.mxu0 %v169_v3  ;;  %s145_s25 = scalar_lea.vmem %s110_s1, 128  ;;  %p150_p1 = scmp.lt.s32.totalorder %s110_s1, %s110_s1 }
   0x6   :  { %p146_p0 = scmp.ne.s32.totalorder %s110_s1, %s145_s25  ;;  %p151_p2 = scmp.lt.s32.totalorder %s145_s25, %s145_s25 }
   0x8   :  { %140 = vmatpush3.bf16.msra.mxu0 %v139_v7  ;;  %p152_p3 = por %p151_p2, %p150_p1 }
   0xa   :  { %p153_p4 = pnand %p152_p3, %p146_p0 }
   0xb   :  { %133 = vmatmul.mubr.msk.f32.vlgmr.msra.gmra.mrb[0].mxu0 %vm27_vm1, %v15_v8 }
  0xde   :  { %v97_v10 = vpop.f32.mrb[0].mxu0 }
  0xdf   :  { %v98_v11 = vadd.f32 %v117_v9, %v97_v10  ;;  %v134_v12 = vpop.f32.mrb[1].mxu0 }
  0xe1   :  { %102 = vst.msk [vmem:[#allocation2] sm:$0xff] %vm101_vm2, %v98_v11 }
  0xe2   :  { %156 = shalt.err (!%p153_p4)
}
  0xe3   :  { %s157_s27 = scalar_lea.hbm %s226_s3, 128 }
  0xe4   :  { %p158_p5 = scmp.ne.s32.totalorder %s226_s3, %s157_s27  ;;  %p161_p6 = scmp.lt.u32.totalorder %s157_s27, %s226_s3 }
  0xe6   :  { %p163_p7 = pnand %p161_p6, %p158_p5 }
  0xe8   :  { %166 = shalt.err (!%p163_p7)
}
  0xe9   :  { %112 = dma.vmem_to_hbm [thread:$0]  %s110_s1, 128, %s226_s3, [#allocation3]  }
  0xea   :  { %167 = dma.done.wait [#allocation3], 128  }
  0xeb   :  { %168 = vsyncadd [#allocation3], 4294967168 }
  0xec   :  { %116 = vsyncpa [#allocation3], 1 }

</bundles_post_ra>
